<compile_context>
chip_gen: v6e
topology: v6e:2x2x1
jax: 0.10.0
libtpu: 0.0.40
codegen_flags: <defaults>
</compile_context>

<pallas_src>
import functools

import jax
import jax.numpy as jnp
from jax.experimental import pallas as pl
from jax.experimental.pallas import tpu as pltpu

NUM_CLASSES = 53
NUM_CLASSES_PAD = 128      # lane-dense classifier output (sliced back to 53 outside the kernel)
ENET_OUT = 1280            # efficientnet_b0 feature width
STEM_OUT = 32              # efficientnet_b0 stem conv output channels
STEM_K = 3 * 3 * 3         # im2col K for the 3x3 stride-2 stem conv


def _silu(x):
    # x * sigmoid(x) == 0.5 * x * (1 + tanh(0.5 * x)):
    # one EUP op (tanh) instead of two (exp + reciprocal) -> ~2x less load on the EUP bottleneck.
    return 0.5 * x * (1.0 + jnp.tanh(0.5 * x))


# --------------------------------------------------------------------------
# Fused Pallas kernel: stem GEMM + head GEMM + global-avg-pool + classifier
# --------------------------------------------------------------------------
def _fused_forward_kernel(p_ref, ws_ref, bs_ref, wh_ref, bh_ref, wc_ref, bc_ref,
                          o_ref, acc_ref, *, inv_s):
    t = pl.program_id(1)

    @pl.when(t == 0)
    def _init():
        acc_ref[...] = jnp.zeros_like(acc_ref)

    # stem conv as im2col GEMM (BatchNorm scale folded into the bf16 weights) + bias + SiLU
    y = jnp.dot(p_ref[...], ws_ref[...], preferred_element_type=jnp.float32)
    y = _silu(y + bs_ref[...])

    # 1x1 conv_head GEMM (BN folded) + bias + SiLU
    h = jnp.dot(y.astype(jnp.bfloat16), wh_ref[...], preferred_element_type=jnp.float32)
    h = _silu(h + bh_ref[...])

    # global-average-pool numerator, accumulated across spatial tiles in VMEM (f32)
    acc_ref[...] += jnp.sum(h, axis=0, keepdims=True)

    @pl.when(t == pl.num_programs(1) - 1)
    def _finalize():
        pooled = acc_ref[...] * inv_s                                  # (1, 1280) f32
        logits = jnp.dot(pooled.astype(jnp.bfloat16), wc_ref[...],
                         preferred_element_type=jnp.float32) + bc_ref[...]
        o_ref[...] = logits                                            # lane-dense (1, 128) store


def _choose_spatial_tile(s, target=512):
    # Largest multiple-of-8 divisor of s that is <= target; fall back to the full extent.
    # target=512 keeps the f32 (tile, 1280) head activation (+ epilogue temporaries) well under the
    # 32 MiB scoped-VMEM budget while amortizing the ~0.35 us per-grid-step overhead.
    best = None
    for cand in range(8, min(s, target) + 1, 8):
        if s % cand == 0:
            best = cand
    return best if best is not None else s


def fused_forward(patches, w_stem, b_stem, w_head, b_head, w_cls, b_cls,
                  *, spatial_tile=None):
    bsz, s, k = patches.shape
    ts = _choose_spatial_tile(s) if spatial_tile is None else spatial_tile
    assert s % ts == 0, "spatial_tile must divide OH*OW"
    n_pad = w_cls.shape[1]

    kernel = functools.partial(_fused_forward_kernel, inv_s=1.0 / s)
    out = pl.pallas_call(
        kernel,
        out_shape=jax.ShapeDtypeStruct((bsz, 1, n_pad), jnp.float32),
        grid_spec=pltpu.PrefetchScalarGridSpec(
            num_scalar_prefetch=0,
            grid=(bsz, s // ts),
            in_specs=[
                # per-tile im2col rows (double-buffered by BlockSpec pipelining)
                pl.BlockSpec((None, ts, k), lambda b, t: (b, t, 0)),
                # weights / biases: constant index_map -> fetched once, stay VMEM-resident
                pl.BlockSpec(w_stem.shape, lambda b, t: (0, 0)),
                pl.BlockSpec(b_stem.shape, lambda b, t: (0, 0)),
                pl.BlockSpec(w_head.shape, lambda b, t: (0, 0)),
                pl.BlockSpec(b_head.shape, lambda b, t: (0, 0)),
                pl.BlockSpec(w_cls.shape, lambda b, t: (0, 0)),
                pl.BlockSpec(b_cls.shape, lambda b, t: (0, 0)),
            ],
            out_specs=pl.BlockSpec((None, 1, n_pad), lambda b, t: (b, 0, 0)),
            scratch_shapes=[pltpu.VMEM((1, ENET_OUT), jnp.float32)],
        ),
        compiler_params=pltpu.CompilerParams(
            dimension_semantics=("parallel", "arbitrary"),
            vmem_limit_bytes=32 * 1024 * 1024,
        ),
    )(patches, w_stem, b_stem, w_head, b_head, w_cls, b_cls)
    return out.reshape(bsz, n_pad)


# --------------------------------------------------------------------------
# Glue (pure JAX): im2col patch extraction for the 3x3 stride-2 stem conv
# --------------------------------------------------------------------------
def im2col(x_nhwc, kh, kw, stride, pad):
    b, h, w, c = x_nhwc.shape
    xp = jnp.pad(x_nhwc, ((0, 0), (pad, pad), (pad, pad), (0, 0)))
    oh = (h + 2 * pad - kh) // stride + 1
    ow = (w + 2 * pad - kw) // stride + 1
    patches = []
    for i in range(kh):
        for j in range(kw):
            patches.append(xp[:, i:i + stride * oh:stride, j:j + stride * ow:stride, :])
    p = jnp.stack(patches, axis=3)              # (B, OH, OW, KH*KW, C)
    return p.reshape(b, oh * ow, kh * kw * c), oh, ow


# --------------------------------------------------------------------------
# Model: deterministic synthetic parameters (BN folded, GEMM weights in bf16) + forward
# --------------------------------------------------------------------------
def init_params(key):
    ks = jax.random.split(key, 8)
    p = {}
    # stem conv 3x3/s2: weight (KH*KW*IC, OC); BatchNorm scale folded into the weight once.
    w_stem = jax.random.normal(ks[0], (STEM_K, STEM_OUT), jnp.float32) * 0.1
    s_stem = 1.0 + 0.01 * jax.random.normal(ks[1], (1, STEM_OUT), jnp.float32)
    p["w_stem"] = (w_stem * s_stem).astype(jnp.bfloat16)
    p["b_stem"] = 0.01 * jax.random.normal(ks[2], (1, STEM_OUT), jnp.float32)
    # conv_head 1x1: 32 -> 1280 (stands in after the omitted MBConv stack); BN folded.
    w_head = jax.random.normal(ks[3], (STEM_OUT, ENET_OUT), jnp.float32) * 0.05
    s_head = 1.0 + 0.01 * jax.random.normal(ks[4], (1, ENET_OUT), jnp.float32)
    p["w_head"] = (w_head * s_head).astype(jnp.bfloat16)
    p["b_head"] = 0.01 * jax.random.normal(ks[5], (1, ENET_OUT), jnp.float32)
    # classifier: Flatten + Linear(1280 -> 53), zero-padded to 128 output lanes.
    w_cls = jax.random.normal(ks[6], (ENET_OUT, NUM_CLASSES), jnp.float32) * 0.02
    b_cls = 0.01 * jax.random.normal(ks[7], (1, NUM_CLASSES), jnp.float32)
    p["w_cls"] = jnp.pad(w_cls, ((0, 0), (0, NUM_CLASSES_PAD - NUM_CLASSES))).astype(jnp.bfloat16)
    p["b_cls"] = jnp.pad(b_cls, ((0, 0), (0, NUM_CLASSES_PAD - NUM_CLASSES)))
    return p


def simple_card_classifier_forward(params, x_nchw, *, spatial_tile=None):
    x_nhwc = jnp.transpose(x_nchw, (0, 2, 3, 1)).astype(jnp.bfloat16)
    # TODO(synk): im2col still materializes the 9x patch tensor in HBM (bf16 halves the bytes);
    # an in-kernel gather of the raw NHWC tile would remove this extra HBM pass.
    patches, _, _ = im2col(x_nhwc, 3, 3, stride=2, pad=1)     # (B, OH*OW, 27) bf16
    logits_pad = fused_forward(
        patches,
        params["w_stem"], params["b_stem"],
        params["w_head"], params["b_head"],
        params["w_cls"], params["b_cls"],
        spatial_tile=spatial_tile)
    return logits_pad[:, :NUM_CLASSES]                         # (B, 53) f32


# --------------------------------------------------------------------------
# Pure-JAX reference (same bf16 casting as the kernel) for correctness check
# --------------------------------------------------------------------------
def _reference_forward(params, x_nchw):
    x_nhwc = jnp.transpose(x_nchw, (0, 2, 3, 1)).astype(jnp.bfloat16)
    patches, _, _ = im2col(x_nhwc, 3, 3, stride=2, pad=1)
    b, s, k = patches.shape
    p = patches.reshape(b * s, k)
    y = jnp.dot(p, params["w_stem"], preferred_element_type=jnp.float32) + params["b_stem"]
    y = y * jax.nn.sigmoid(y)
    h = jnp.dot(y.astype(jnp.bfloat16), params["w_head"],
                preferred_element_type=jnp.float32) + params["b_head"]
    h = h * jax.nn.sigmoid(h)
    pooled = jnp.mean(h.reshape(b, s, ENET_OUT), axis=1)
    logits = jnp.dot(pooled.astype(jnp.bfloat16), params["w_cls"],
                     preferred_element_type=jnp.float32) + params["b_cls"]
    return logits[:, :NUM_CLASSES]


if __name__ == "__main__":
    key = jax.random.PRNGKey(0)
    k_param, k_x = jax.random.split(key)
    params = init_params(k_param)

    # small NCHW image batch: (B=2, C=3, H=16, W=16) -> OH=OW=8, S=64 spatial rows
    x = jax.random.normal(k_x, (2, 3, 16, 16), jnp.float32)

    # spatial_tile=16 -> 4 spatial tiles per image: exercises the init/accumulate/finalize
    # pooling path; at realistic image sizes the default auto-picks tiles up to 512 rows.
    logits = simple_card_classifier_forward(params, x, spatial_tile=16)
    jax.block_until_ready(logits)

    assert logits.shape == (2, NUM_CLASSES)
    assert logits.dtype == jnp.float32

    ref = _reference_forward(params, x)
    assert jnp.allclose(logits, ref, atol=1e-2, rtol=1e-2), float(jnp.max(jnp.abs(logits - ref)))
    print("KERNEL_OK")
</pallas_src>

<mosaic_0001>
module attributes {stable_mosaic.version = 11 : i64} {
  func.func @_fused_forward_kernel(%arg0: i32, %arg1: i32, %arg2: memref<1x16x27xbf16, #tpu.memory_space<vmem>>, %arg3: memref<27x32xbf16, #tpu.memory_space<vmem>>, %arg4: memref<1x32xf32, #tpu.memory_space<vmem>>, %arg5: memref<32x1280xbf16, #tpu.memory_space<vmem>>, %arg6: memref<1x1280xf32, #tpu.memory_space<vmem>>, %arg7: memref<1280x128xbf16, #tpu.memory_space<vmem>>, %arg8: memref<1x128xf32, #tpu.memory_space<vmem>>, %arg9: memref<1x1x128xf32, #tpu.memory_space<vmem>>, %arg10: memref<1x1280xf32, #tpu.memory_space<vmem>>) attributes {dimension_semantics = [#tpu.dimension_semantics<parallel>, #tpu.dimension_semantics<arbitrary>], iteration_bounds = array<i64: 2, 4>, scalar_prefetch = 0 : i64, scratch_operands = 1 : i64, tpu.core_type = #tpu.core_type<tc>, window_params = [{transform_indices = @transform_0, window_bounds = array<i64: 1, 16, 27>}, {pipeline_mode = #tpu.pipeline_mode<synchronous>, transform_indices = @transform_1, window_bounds = array<i64: 27, 32>}, {pipeline_mode = #tpu.pipeline_mode<synchronous>, transform_indices = @transform_2, window_bounds = array<i64: 1, 32>}, {pipeline_mode = #tpu.pipeline_mode<synchronous>, transform_indices = @transform_3, window_bounds = array<i64: 32, 1280>}, {pipeline_mode = #tpu.pipeline_mode<synchronous>, transform_indices = @transform_4, window_bounds = array<i64: 1, 1280>}, {pipeline_mode = #tpu.pipeline_mode<synchronous>, transform_indices = @transform_5, window_bounds = array<i64: 1280, 128>}, {pipeline_mode = #tpu.pipeline_mode<synchronous>, transform_indices = @transform_6, window_bounds = array<i64: 1, 128>}, {transform_indices = @transform_7, window_bounds = array<i64: 1, 1, 128>}]} {
    %c0_i32 = arith.constant 0 : i32
    %0 = arith.cmpi eq, %arg1, %c0_i32 : i32
    %1 = arith.extui %0 : i1 to i32
    %c0_i32_0 = arith.constant 0 : i32
    %2 = arith.cmpi ne, %1, %c0_i32_0 : i32
    scf.if %2 {
      %cst_24 = arith.constant 0.000000e+00 : f32
      %40 = vector.broadcast %cst_24 : f32 to vector<1x1280xf32>
      %c0_25 = arith.constant 0 : index
      %c0_26 = arith.constant 0 : index
      %41 = vector.load %arg10[%c0_25, %c0_26] : memref<1x1280xf32, #tpu.memory_space<vmem>>, vector<1x1280xf32>
      tpu.vector_store %arg10[%c0_25, %c0_26], %40 {strides = array<i32>} : memref<1x1280xf32, #tpu.memory_space<vmem>>, vector<1x1280xf32>,
    } else {
    }
    %c0 = arith.constant 0 : index
    %c0_1 = arith.constant 0 : index
    %c0_2 = arith.constant 0 : index
    %3 = vector.load %arg2[%c0, %c0_1, %c0_2] : memref<1x16x27xbf16, #tpu.memory_space<vmem>>, vector<1x16x27xbf16>
    %4 = vector.shape_cast %3 : vector<1x16x27xbf16> to vector<16x27xbf16>
    %c0_3 = arith.constant 0 : index
    %c0_4 = arith.constant 0 : index
    %5 = vector.load %arg3[%c0_3, %c0_4] : memref<27x32xbf16, #tpu.memory_space<vmem>>, vector<27x32xbf16>
    %cst = arith.constant dense<0.000000e+00> : vector<16x32xf32>
    %6 = tpu.matmul %4, %5, %cst {dimension_numbers = #tpu.dot_dimension_numbers<[1], [0], [0], [1], [0, 0, 1, 1], [], []>} : vector<16x27xbf16>, vector<27x32xbf16>, vector<16x32xf32> -> vector<16x32xf32>
    %c0_5 = arith.constant 0 : index
    %c0_6 = arith.constant 0 : index
    %7 = vector.load %arg4[%c0_5, %c0_6] : memref<1x32xf32, #tpu.memory_space<vmem>>, vector<1x32xf32>
    %8 = vector.broadcast %7 : vector<1x32xf32> to vector<16x32xf32>
    %9 = arith.addf %6, %8 : vector<16x32xf32>
    %cst_7 = arith.constant 5.000000e-01 : f32
    %10 = vector.broadcast %cst_7 : f32 to vector<16x32xf32>
    %11 = arith.mulf %10, %9 : vector<16x32xf32>
    %cst_8 = arith.constant 5.000000e-01 : f32
    %12 = vector.broadcast %cst_8 : f32 to vector<16x32xf32>
    %13 = arith.mulf %12, %9 : vector<16x32xf32>
    %14 = math.tanh %13 : vector<16x32xf32>
    %cst_9 = arith.constant 1.000000e+00 : f32
    %15 = vector.broadcast %cst_9 : f32 to vector<16x32xf32>
    %16 = arith.addf %15, %14 : vector<16x32xf32>
    %17 = arith.mulf %11, %16 : vector<16x32xf32>
    %18 = arith.truncf %17 : vector<16x32xf32> to vector<16x32xbf16>
    %c0_10 = arith.constant 0 : index
    %c0_11 = arith.constant 0 : index
    %19 = vector.load %arg5[%c0_10, %c0_11] : memref<32x1280xbf16, #tpu.memory_space<vmem>>, vector<32x1280xbf16>
    %cst_12 = arith.constant dense<0.000000e+00> : vector<16x1280xf32>
    %20 = tpu.matmul %18, %19, %cst_12 {dimension_numbers = #tpu.dot_dimension_numbers<[1], [0], [0], [1], [0, 0, 1, 1], [], []>} : vector<16x32xbf16>, vector<32x1280xbf16>, vector<16x1280xf32> -> vector<16x1280xf32>
    %c0_13 = arith.constant 0 : index
    %c0_14 = arith.constant 0 : index
    %21 = vector.load %arg6[%c0_13, %c0_14] : memref<1x1280xf32, #tpu.memory_space<vmem>>, vector<1x1280xf32>
    %22 = vector.broadcast %21 : vector<1x1280xf32> to vector<16x1280xf32>
    %23 = arith.addf %20, %22 : vector<16x1280xf32>
    %cst_15 = arith.constant 5.000000e-01 : f32
    %24 = vector.broadcast %cst_15 : f32 to vector<16x1280xf32>
    %25 = arith.mulf %24, %23 : vector<16x1280xf32>
    %cst_16 = arith.constant 5.000000e-01 : f32
    %26 = vector.broadcast %cst_16 : f32 to vector<16x1280xf32>
    %27 = arith.mulf %26, %23 : vector<16x1280xf32>
    %28 = math.tanh %27 : vector<16x1280xf32>
    %cst_17 = arith.constant 1.000000e+00 : f32
    %29 = vector.broadcast %cst_17 : f32 to vector<16x1280xf32>
    %30 = arith.addf %29, %28 : vector<16x1280xf32>
    %31 = arith.mulf %25, %30 : vector<16x1280xf32>
    %c0_18 = arith.constant 0 : index
    %c0_19 = arith.constant 0 : index
    %32 = vector.load %arg10[%c0_18, %c0_19] : memref<1x1280xf32, #tpu.memory_space<vmem>>, vector<1x1280xf32>
    %cst_20 = arith.constant dense<0.000000e+00> : vector<1280xf32>
    %33 = vector.multi_reduction <add>, %31, %cst_20 [0] : vector<16x1280xf32> to vector<1280xf32>
    %34 = vector.shape_cast %33 : vector<1280xf32> to vector<1x1280xf32>
    %35 = arith.addf %32, %34 : vector<1x1280xf32>
    %c0_21 = arith.constant 0 : index
    %c0_22 = arith.constant 0 : index
    %36 = vector.load %arg10[%c0_21, %c0_22] : memref<1x1280xf32, #tpu.memory_space<vmem>>, vector<1x1280xf32>
    tpu.vector_store %arg10[%c0_21, %c0_22], %35 {strides = array<i32>} : memref<1x1280xf32, #tpu.memory_space<vmem>>, vector<1x1280xf32>,
    %c3_i32 = arith.constant 3 : i32
    %37 = arith.cmpi eq, %arg1, %c3_i32 : i32
    %38 = arith.extui %37 : i1 to i32
    %c0_i32_23 = arith.constant 0 : i32
    %39 = arith.cmpi ne, %38, %c0_i32_23 : i32
    scf.if %39 {
      %c0_24 = arith.constant 0 : index
      %c0_25 = arith.constant 0 : index
      %40 = vector.load %arg10[%c0_24, %c0_25] : memref<1x1280xf32, #tpu.memory_space<vmem>>, vector<1x1280xf32>
      %cst_26 = arith.constant 1.562500e-02 : f32
      %41 = vector.broadcast %cst_26 : f32 to vector<1x1280xf32>
      %42 = arith.mulf %40, %41 : vector<1x1280xf32>
      %43 = arith.truncf %42 : vector<1x1280xf32> to vector<1x1280xbf16>
      %c0_27 = arith.constant 0 : index
      %c0_28 = arith.constant 0 : index
      %44 = vector.load %arg7[%c0_27, %c0_28] : memref<1280x128xbf16, #tpu.memory_space<vmem>>, vector<1280x128xbf16>
      %cst_29 = arith.constant dense<0.000000e+00> : vector<1x128xf32>
      %45 = tpu.matmul %43, %44, %cst_29 {dimension_numbers = #tpu.dot_dimension_numbers<[1], [0], [0], [1], [0, 0, 1, 1], [], []>} : vector<1x1280xbf16>, vector<1280x128xbf16>, vector<1x128xf32> -> vector<1x128xf32>
      %c0_30 = arith.constant 0 : index
      %c0_31 = arith.constant 0 : index
      %46 = vector.load %arg8[%c0_30, %c0_31] : memref<1x128xf32, #tpu.memory_space<vmem>>, vector<1x128xf32>
      %47 = arith.addf %45, %46 : vector<1x128xf32>
      %c0_32 = arith.constant 0 : index
      %c0_33 = arith.constant 0 : index
      %c0_34 = arith.constant 0 : index
      %48 = vector.load %arg9[%c0_32, %c0_33, %c0_34] : memref<1x1x128xf32, #tpu.memory_space<vmem>>, vector<1x1x128xf32>
      %49 = vector.shape_cast %48 : vector<1x1x128xf32> to vector<1x128xf32>
      %50 = vector.shape_cast %47 : vector<1x128xf32> to vector<1x1x128xf32>
      tpu.vector_store %arg9[%c0_32, %c0_33, %c0_34], %50 {strides = array<i32>} : memref<1x1x128xf32, #tpu.memory_space<vmem>>, vector<1x1x128xf32>,
    } else {
    }
    return
  }
  func.func @transform_0(%arg0: i32, %arg1: i32) -> (i32, i32, i32) {
    %c0_i32 = arith.constant 0 : i32
    %c0_i32_0 = arith.constant 0 : i32
    return %arg0, %arg1, %c0_i32 : i32, i32, i32
  }
  func.func @transform_1(%arg0: i32, %arg1: i32) -> (i32, i32) {
    %c0_i32 = arith.constant 0 : i32
    %c0_i32_0 = arith.constant 0 : i32
    %c0_i32_1 = arith.constant 0 : i32
    return %c0_i32, %c0_i32_0 : i32, i32
  }
  func.func @transform_2(%arg0: i32, %arg1: i32) -> (i32, i32) {
    %c0_i32 = arith.constant 0 : i32
    %c0_i32_0 = arith.constant 0 : i32
    %c0_i32_1 = arith.constant 0 : i32
    return %c0_i32, %c0_i32_0 : i32, i32
  }
  func.func @transform_3(%arg0: i32, %arg1: i32) -> (i32, i32) {
    %c0_i32 = arith.constant 0 : i32
    %c0_i32_0 = arith.constant 0 : i32
    %c0_i32_1 = arith.constant 0 : i32
    return %c0_i32, %c0_i32_0 : i32, i32
  }
  func.func @transform_4(%arg0: i32, %arg1: i32) -> (i32, i32) {
    %c0_i32 = arith.constant 0 : i32
    %c0_i32_0 = arith.constant 0 : i32
    %c0_i32_1 = arith.constant 0 : i32
    return %c0_i32, %c0_i32_0 : i32, i32
  }
  func.func @transform_5(%arg0: i32, %arg1: i32) -> (i32, i32) {
    %c0_i32 = arith.constant 0 : i32
    %c0_i32_0 = arith.constant 0 : i32
    %c0_i32_1 = arith.constant 0 : i32
    return %c0_i32, %c0_i32_0 : i32, i32
  }
  func.func @transform_6(%arg0: i32, %arg1: i32) -> (i32, i32) {
    %c0_i32 = arith.constant 0 : i32
    %c0_i32_0 = arith.constant 0 : i32
    %c0_i32_1 = arith.constant 0 : i32
    return %c0_i32, %c0_i32_0 : i32, i32
  }
  func.func @transform_7(%arg0: i32, %arg1: i32) -> (i32, i32, i32) {
    %c0_i32 = arith.constant 0 : i32
    %c0_i32_0 = arith.constant 0 : i32
    %c0_i32_1 = arith.constant 0 : i32
    return %arg0, %c0_i32, %c0_i32_0 : i32, i32, i32
  }
}

</mosaic_0001>

<bundles_post_ra>
// kernel: tpu_custom_call.1
= control target key start
LH: loop header
LB: loop body
LE: loop exit
PB: predicated region body
PF: predicated region fallthrough
CT: control target
= control target key end

     0   :  { %12 = vsyncpa [#allocation4], 0  ;;  %s3146_s0 = inlined_call_operand.vmem [shape: bf16[2,64,27], index: 0, kind: input, shape index: {}]   ;;  %s3147_s1 = inlined_call_operand.vmem [shape: bf16[27,32], index: 1, kind: input, shape index: {}]   ;;  %s3148_s2 = inlined_call_operand.vmem [shape: f32[1,32], index: 2, kind: input, shape index: {}]   ;;  %s3149_s3 = inlined_call_operand.hbm [shape: bf16[32,1280], index: 3, kind: input, shape index: {}]   ;;  %s3150_s4 = inlined_call_operand.vmem [shape: f32[1,1280], index: 4, kind: input, shape index: {}]   ;;  %s3151_s5 = inlined_call_operand.hbm [shape: bf16[1280,128], index: 5, kind: input, shape index: {}]   ;;  %s3152_s6 = inlined_call_operand.vmem [shape: f32[1,128], index: 6, kind: input, shape index: {}]   ;;  %s3153_s7 = inlined_call_operand.hbm [shape: f32[2,1,128], index: 7, kind: output, shape index: {}]  }
   0x1   :  { %13 = vsyncpa [#allocation7], 0 }
   0x2   :  { %14 = vsyncpa [#allocation5], 0 }
   0x3   :  { %16 = vsyncpa [#allocation5 + $0x1], 0  ;;  %s2797_s24 = smov 0   ;;  %s2799_s25 = smov 0  }
   0x4   :  { %s2801_s26 = smov 0   ;;  %s2803_s27 = smov 0  }
   0x5   :  { %s2805_s28 = smov 0   ;;  %s2807_s29 = smov 0  }
   0x6   :  { %s2809_s30 = smov 0   ;;  %s2811_s8 = smov 0  }
   0x7 LB: > { %3156 = sst [smem:[#allocation12_spill]] %s2738_s30  ;;  %s2083_s9 = sadd.s32 4294967295, %s2742_s8   ;;  %s2742_s8 = sphi %s2811_s8, %s22_s8   ;;  %s2738_s30 = sphi %s2809_s30, %s3166_s30   ;;  %s2734_s29 = sphi %s2807_s29, %s3171_s29   ;;  %s2730_s28 = sphi %s2805_s28, %s3164_s28   ;;  %s2726_s27 = sphi %s2803_s27, %s3170_s27   ;;  %s2722_s26 = sphi %s2801_s26, %s3169_s26   ;;  %s2718_s25 = sphi %s2799_s25, %s3168_s25   ;;  %s2714_s24 = sphi %s2797_s24, %s3167_s24  }
   0x8   : > { %s2084_s10 = sadd.s32 4294967294, %s2742_s8   ;;  %s31_s11 = sadd.s32 1, %s2734_s29 }
   0x9   : > { %s34_s12 = sadd.s32 1, %s2738_s30  ;;  %p32_p0 = scmp.ge.s32.totalorder %s31_s11, 4 }
   0xa   : > { %s195_s13 = sadd.s32 1, %s2722_s26  ;;  %p205_p1 = scmp.ne.s32.totalorder %s2722_s26, %s2718_s25 }
   0xb   : > { %p206_p2 = scmp.eq.s32.totalorder %s2083_s9, 7  ;;  %s3173_s11 = smov (%p32_p0, %s31_s11), 0 }
   0xc   : > { %3157 = sst [smem:[#allocation13_spill]] %s3173_s11  ;;  %s3175_s12 = smov (!%p32_p0, %s34_s12), %s2738_s30 }
   0xd   : > { %p2847_p3 = por %p206_p2, %p205_p1  ;;  %p211_p4 = scmp.ne.s32.totalorder %s2718_s25, %s2714_s24 }
   0xe   : > { %p36_p5 = scmp.ge.s32.totalorder %s3175_s12, 2  ;;  %p212_p6 = scmp.eq.s32.totalorder %s2084_s10, 7 }
   0xf   : > { %p2085_p7 = scmp.ge.s32.totalorder %s2742_s8, 1  ;;  %p219_p8 = scmp.lt.s32.totalorder %s2742_s8, 9 }
  0x10   : > { %s3177_s12 = smov (%p36_p5, %s3175_s12), 0  ;;  %p2857_p9 = por %p212_p6, %p211_p4 }
  0x11   : > { %3159 = sst [smem:[#allocation14_spill]] %s3177_s12  ;;  %p2861_p10 = pnand %p2085_p7, %p219_p8 }
  0x12   : > { %s192_s17 = ssub.s32 %s2738_s30, %s3177_s12  ;;  %p2869_p13 = scmp.eq.s32.totalorder %s2083_s9, 0 }
  0x13   : > { %p193_p11 = scmp.eq.s32.totalorder %s192_s17, 0  ;;  %p2341_p12 = pneg %p2861_p10 }
  0x14   : > { %s2744_s20 = smov [#allocation3]  }
  0x15   : > { %s2874_s19 = scalar_select %p193_p11, %s2722_s26, %s195_s13  }
  0x16   : > { %s237_s21 = sshll.u32 %s2744_s20, 4  ;;  %p2878_p0 = pnand %p2869_p13, %p2341_p12  ;;  %s238_s21 = int_to_ptr.vmem [resolvable:$true] %s237_s21 }
  0x17   : > { %s2601_s23 = scalar_lea.vmem %s238_s21, 2560  ;;  %p2609_p6 = scmp.lt.s32.totalorder %s238_s21, %s238_s21 }
  0x18   : > { %p2592_p1 = pneg %p2878_p0  ;;  %p2602_p2 = scmp.ne.s32.totalorder %s238_s21, %s2601_s23 }
  0x19   : > { %p2610_p7 = scmp.lt.s32.totalorder %s2601_s23, %s2601_s23 }
  0x1a   : > { %p2604_p4 = pnand %p2602_p2, %p2592_p1 }
  0x1b   : > { %p2611_p8 = por %p2610_p7, %p2609_p6 }
  0x1c   : > { %p2605_p5 = pneg %p2604_p4 }
  0x1e   : > { %p2612_p11 = pnand %p2611_p8, %p2605_p5 }
  0x20   : > { %2615 = shalt.err (!%p2612_p11)
}
  0x21   : > { %s2745_s9 = smov 640   ;;  %s2746_s10 = smov 40  }
  0x22   : > { %2344 = dma.hbm_to_vmem [thread:$0]  (!%p2878_p0), %s3149_s3, 2560, %s238_s21, [#allocation4], %s2745_s9, %s2745_s9, %s2746_s10  }
  0x23   : > { %s2747_s20 = smov [#allocation6]  }
  0x24   : > { %s253_s12 = sshll.u32 %s2747_s20, 4  ;;  %s254_s12 = int_to_ptr.vmem [resolvable:$true] %s253_s12 }
  0x25   : > { %s2627_s11 = scalar_lea.vmem %s254_s12, 10240  ;;  %p2635_p5 = scmp.lt.s32.totalorder %s254_s12, %s254_s12 }
  0x26   : > { %p2628_p12 = scmp.ne.s32.totalorder %s254_s12, %s2627_s11  ;;  %p2636_p6 = scmp.lt.s32.totalorder %s2627_s11, %s2627_s11 }
  0x28   : > { %p2630_p2 = pnand %p2628_p12, %p2592_p1  ;;  %p2637_p7 = por %p2636_p6, %p2635_p5 }
  0x2a   : > { %p2631_p4 = pneg %p2630_p2 }
  0x2c   : > { %p2638_p8 = pnand %p2637_p7, %p2631_p4 }
  0x2e   : > { %2641 = shalt.err (!%p2638_p8)
}
  0x2f   : > { %s2748_s23 = smov 64   ;;  %s2749_s30 = smov 4  }
  0x30   : > { %2347 = dma.hbm_to_vmem [thread:$0]  (!%p2878_p0), %s3151_s5, 10240, %s254_s12, [#allocation7], %s2748_s23, %s2748_s23, %s2749_s30  }
  0x31   : > { %285 = sbr.rel (%p2861_p10) target bundleno = 887 (0x377), region = 48 }
  0x36   : > { %2701 = dma.done.wait (%p2869_p13), [#allocation4], 2560  }
  0x37   : > { %2703 = vsyncadd (%p2869_p13), [#allocation4], 4294964736 }
  0x38   : > { %2705 = dma.done.wait (%p2869_p13), [#allocation7], 10240  }
  0x39   : > { %2707 = vsyncadd (%p2869_p13), [#allocation7], 4294957056  ;;  %s322_s30 = sand.u32 1, %s2718_s25   ;;  %s2092_s11 = sshll.u32 %s2726_s27, 1 }
  0x3a   : > { %p325_p10 = scmp.lt.s32.totalorder %s2730_s28, 1  ;;  %p327_p0 = scmp.lt.s32.totalorder %s2092_s11, 7 }
  0x3b   : > { %s2919_s18 = scalar_lea.vmem [#allocation8], %s322_s30  ;;  %p2095_p13 = scmp.ne.s32.totalorder %s2726_s27, 0 }
  0x3c   : > { %s326_s12 = scalar_select %p325_p10, %s2730_s28, 1 }
  0x3d   : > { %s3179_s11 = smov (!%p327_p0, %s2092_s11), 7  ;;  %338 = sbr.rel (%p2095_p13) target bundleno = 70 (0x46), region = 60 }
  0x3e   : > { %s2093_s16 = sshll.u32 %s326_s12, 3 }
  0x3f   : > { %s330_s22 = sadd.s32 %s2093_s16, %s3179_s11 }
  0x40   : > { %s2094_s9 = sshll.u32 %s330_s22, 2 }
  0x41   : > { %s332_s20 = scalar_lea.vmem %s3146_s0, %s2094_s9 }
  0x42   : > { %v340_v0 = vlaneseq  ;;  %v2750_v1 = vmov 0.0  }
  0x43   : > { %339 = vst [vmem:[#allocation2] sm:$0xff] %v2750_v1 }
  0x44   : > { %vm342_vm0 = vcmp.lt.s32.totalorder %v340_v0, 256 }
  0x45   : > { %344 = vst.msk [vmem:[#allocation2 + $0x8] sm:$0x3] %vm342_vm0, %v2750_v1 }
  0x46 PF: > { %vm378_vm1 = vcmask 1044480   ;;  %v2751_v2 = vmov 0.0   ;;  %v2433_v3 = vld [vmem:[%s3147_s1 + $0x8] sm:$0x3f]   ;;  %vm379_vm2 = vcmask 1045504   ;;  %v2752_v4 = vmov 65535  }
  0x47   : > { %2323 = vmatprep.subr.bf16.mxu0 %v2751_v2  ;;  %v380_v5 = vsel %vm378_vm1, 4294967295, %v2752_v4  ;;  %vm2753_vm3 = vmmov 0   ;;  %v2434_v8 = vld [vmem:[%s3147_s1] sm:$0xff]   ;;  %vm374_vm4 = vcmask 220160   ;;  %v2442_v14 = vld [vmem:[#allocation3 + $0x4] ss:$40 sps:$4 sm:$0xff]   ;;  %v459_v47 = vlaneseq }
  0x48   : > { %v381_v6 = vsel %vm379_vm2, %v380_v5, 0  ;;  %2327 = vmatprep.mubr.msk.bf16.mxu0 %vm2753_vm3, %v2751_v2  ;;  %v2435_v9 = vld [vmem:[%s332_s20] sm:$0xff]   ;;  %v2444_v16 = vld [vmem:[#allocation3] ss:$40 sps:$4 sm:$0xff]   ;;  %v2450_v18 = vld [vmem:[#allocation3 + $0x64] ss:$40 sps:$4 sm:$0xff]  }
  0x49   : > { %v383_v7 = vand.u32 %v2433_v3, %v381_v6  ;;  %v2436_v10 = vld [vmem:[#allocation3 + $0x54] ss:$40 sps:$4 sm:$0xff]   ;;  %v2438_v12 = vld [vmem:[#allocation3 + $0x50] ss:$40 sps:$4 sm:$0xff]   ;;  %v2754_v19 = vmov 0   ;;  %vm609_vm5 = vcmask 261120  }
  0x4a   : > { %v2441_v11 = vld [vmem:[#allocation3 + $0x5c] ss:$40 sps:$4 sm:$0xff]   ;;  %v2439_v13 = vld [vmem:[#allocation3 + $0x58] ss:$40 sps:$4 sm:$0xff]   ;;  %625 = vmatprep.subr.bf16.mxu1 %v2436_v10  ;;  %v2447_v15 = vld [vmem:[#allocation3 + $0xc] ss:$40 sps:$4 sm:$0xff]   ;;  %645 = vmatprep.mubr.bf16.mxu1 %v2754_v19 }
  0x4b   : > { %2324 = vmatpush3.bf16.msra.mxu0 %v383_v7  ;;  %626 = vmatpush1.bf16.msra.mxu1 %v2438_v12  ;;  %v2445_v17 = vld [vmem:[#allocation3 + $0x8] ss:$40 sps:$4 sm:$0xff]   ;;  %v2453_v20 = vld [vmem:[#allocation3 + $0x6c] ss:$40 sps:$4 sm:$0xff]   ;;  %v2459_v40 = vld [vmem:[#allocation3 + $0x1c] ss:$40 sps:$4 sm:$0xff]  }
  0x4c   : > { %2325 = vmatprep.subr.bf16.mxu0 %v2751_v2  ;;  %627 = vmatprep.subr.bf16.mxu1 %v2442_v14  ;;  %v2096_v21 = vld [vmem:[%s3148_s2] ss:$0 sm:$0xff]  ;;  %v2448_v36 = vld [vmem:[#allocation3 + $0x60] ss:$40 sps:$4 sm:$0xff]   ;;  %v2454_v41 = vld [vmem:[#allocation3 + $0x10] ss:$40 sps:$4 sm:$0xff]  }
  0x4d   : > { %v2451_v37 = vld [vmem:[#allocation3 + $0x68] ss:$40 sps:$4 sm:$0xff]   ;;  %v2456_v39 = vld [vmem:[#allocation3 + $0x14] ss:$40 sps:$4 sm:$0xff]   ;;  %v2457_v42 = vld [vmem:[#allocation3 + $0x18] ss:$40 sps:$4 sm:$0xff]  }
  0x4e   : > { %v2462_v43 = vld [vmem:[#allocation3 + $0x74] ss:$40 sps:$4 sm:$0xff]   ;;  %v2460_v44 = vld [vmem:[#allocation3 + $0x70] ss:$40 sps:$4 sm:$0xff]   ;;  %v2465_v45 = vld [vmem:[#allocation3 + $0x24] ss:$40 sps:$4 sm:$0xff]  }
  0x4f   : > { %2326 = vmatpush3.bf16.msra.mxu0 %v2434_v8  ;;  %628 = vmatpush1.bf16.msra.mxu1 %v2444_v16  ;;  %v2463_v46 = vld [vmem:[#allocation3 + $0x20] ss:$40 sps:$4 sm:$0xff]   ;;  %v2937_v48 = vshrl.u32 %v459_v47, 7  ;;  %v455_v51 = vld [vmem:[%s3150_s4] sm:$0xff]  ;;  %vm1061_vm6 = vcmp.lt.s32.totalorder %v459_v47, 256  ;;  %p2126_p1 = scmp.ne.s32.totalorder %s2726_s27, 3 }
  0x50   : > { %668 = vmatprep.subr.bf16.mxu0 %v2441_v11  ;;  %711 = vmatprep.subr.bf16.mxu1 %v2450_v18 }
  0x51   : > { %v2940_v49 = vsub.s32 0, %v2937_v48  ;;  %v469_v50 = vsub.s32 2, %v2937_v48  ;;  %v2947_v52 = vsub.s32 1, %v2937_v48  ;;  %v473_v53 = vsub.s32 3, %v2937_v48 }
  0x52   : > { %2328 = vmatmul.mubr.msk.bf16.vlgmr.msra.gmra.mxu0 %vm374_vm4, %v2435_v9  ;;  %v477_v60 = vsub.s32 4, %v2937_v48  ;;  %v485_v61 = vsub.s32 6, %v2937_v48  ;;  %v481_v2 = vsub.s32 5, %v2937_v48  ;;  %v489_v3 = vsub.s32 7, %v2937_v48 }
  0x53   : > { %669 = vmatpush1.bf16.msra.mxu0 %v2439_v13  ;;  %688 = vmatprep.mubr.bf16.mxu0 %v2754_v19  ;;  %v462_v54 = vrot.slane %v455_v51, %v2940_v49  ;;  %v470_v55 = vrot.slane %v455_v51, %v469_v50  ;;  %v466_v56 = vrot.slane %v455_v51, %v2947_v52 }
  0x54   : > { %670 = vmatprep.subr.bf16.mxu0 %v2447_v15  ;;  %v474_v57 = vrot.slane %v455_v51, %v473_v53  ;;  %v478_v10 = vrot.slane %v455_v51, %v477_v60  ;;  %v486_v11 = vrot.slane %v455_v51, %v485_v61  ;;  %v482_v18 = vrot.slane %v455_v51, %v481_v2 }
  0x57   : > { %671 = vmatpush1.bf16.msra.mxu0 %v2445_v17 }
  0x58   : > { %754 = vmatprep.subr.bf16.mxu0 %v2453_v20 }
 0x112   : > { %v419_v22 = vpop.f32.mrf.mxu0 }
 0x113   : > { %v420_v23 = vadd.f32 %v2096_v21, %v419_v22 }
 0x114   : > { %v2329_v24 = vpop.f32.mrf.mxu0 }
 0x115   : > { %v426_v25 = vmul.f32 0.5, %v420_v23 }
 0x116   : > { %v422_v26 = vpop.f32.mrf.mxu0 }
 0x117   : > { %2466 = vtanh.f32 %v426_v25  ;;  %v423_v27 = vadd.f32 %v2096_v21, %v422_v26 }
 0x118   : > { %v2330_v28 = vpop.f32.mrf.mxu0 }
 0x119   : > { %v427_v29 = vmul.f32 0.5, %v423_v27 }
 0x11b   : > { %2468 = vtanh.f32 %v427_v29 }
 0x124   : > { %v2467_v30 = vpop.eup %2466 }
 0x125   : > { %v430_v31 = vadd.f32 1.0, %v2467_v30 }
 0x127   : > { %v432_v34 = vmul.f32 %v430_v31, %v426_v25 }
 0x128   : > { %v2469_v32 = vpop.eup %2468 }
 0x129   : > { %v431_v33 = vadd.f32 1.0, %v2469_v32 }
 0x12b   : > { %v433_v35 = vmul.f32 %v431_v33, %v427_v29  ;;  %v456_v29 = vld [vmem:[%s3150_s4 + $0x8] sm:$0x3] }
 0x12d   : > { %v434_v38 = vpack.c.bf16 %v433_v35, %v432_v34 }
 0x12f   : > { %2121 = vmatmul.mubr.msk.bf16.vlgmr.msra.gmra.mxu1 %vm609_vm5, %v434_v38  ;;  %2122 = vmatmul.mubr.msk.bf16.vlgmr.msra.gmra.mxu0 %vm609_vm5, %v434_v38 }
 0x130   : > { %712 = vmatpush1.bf16.msra.mxu1 %v2448_v36  ;;  %755 = vmatpush1.bf16.msra.mxu0 %v2451_v37 }
 0x131   : > { %713 = vmatprep.subr.bf16.mxu1 %v2456_v39  ;;  %756 = vmatprep.subr.bf16.mxu0 %v2459_v40  ;;  %v494_v39 = vrot.slane %v456_v29, %v2940_v49 }
 0x132   : > { %731 = vmatprep.mubr.bf16.mxu1 %v2754_v19  ;;  %774 = vmatprep.mubr.bf16.mxu0 %v2754_v19 }
 0x134   : > { %714 = vmatpush1.bf16.msra.mxu1 %v2454_v41  ;;  %757 = vmatpush1.bf16.msra.mxu0 %v2457_v42 }
 0x135   : > { %797 = vmatprep.subr.bf16.mxu1 %v2462_v43 }
 0x137   : > { %2123 = vmatmul.mubr.msk.bf16.vlgmr.msra.gmra.mxu1 %vm609_vm5, %v434_v38  ;;  %2124 = vmatmul.mubr.msk.bf16.vlgmr.msra.gmra.mxu0 %vm609_vm5, %v434_v38 }
 0x138   : > { %798 = vmatpush1.bf16.msra.mxu1 %v2460_v44  ;;  %817 = vmatprep.mubr.bf16.mxu1 %v2754_v19  ;;  %v490_v19 = vrot.slane %v455_v51, %v489_v3 }
 0x139   : > { %799 = vmatprep.subr.bf16.mxu1 %v2465_v45 }
 0x13c   : > { %800 = vmatpush1.bf16.msra.mxu1 %v2463_v46  ;;  %v498_v46 = vrot.slane %v456_v29, %v2947_v52 }
 0x13f   : > { %2125 = vmatmul.mubr.msk.bf16.vlgmr.msra.gmra.mxu1 %vm609_vm5, %v434_v38 }
 0x1ef   : > { %v647_v58 = vpop.f32.mrf.mxu1  ;;  %v690_v59 = vpop.f32.mrf.mxu0 }
 0x1f0   : > { %v648_v62 = vadd.f32 %v647_v58, %v462_v54  ;;  %v691_v63 = vadd.f32 %v690_v59, %v470_v55 }
 0x1f1   : > { %v649_v0 = vpop.f32.mrf.mxu1  ;;  %v692_v1 = vpop.f32.mrf.mxu0 }
 0x1f2   : > { %v2960_v4 = vmul.f32 0.5, %v648_v62  ;;  %v2962_v5 = vmul.f32 0.5, %v691_v63  ;;  %v650_v6 = vadd.f32 %v649_v0, %v466_v56  ;;  %v693_v7 = vadd.f32 %v692_v1, %v474_v57 }
 0x1f3   : > { %v651_v8 = vpop.f32.mrf.mxu1  ;;  %v694_v9 = vpop.f32.mrf.mxu0 }
 0x1f4   : > { %2470 = vtanh.f32 %v2960_v4  ;;  %v2969_v12 = vmul.f32 0.5, %v650_v6  ;;  %v2971_v13 = vmul.f32 0.5, %v693_v7  ;;  %v652_v14 = vadd.f32 %v651_v8, %v462_v54 }
 0x1f5   : > { %2472 = vtanh.f32 %v2962_v5  ;;  %v695_v15 = vadd.f32 %v694_v9, %v470_v55  ;;  %v653_v16 = vpop.f32.mrf.mxu1  ;;  %v696_v17 = vpop.f32.mrf.mxu0 }
 0x1f6   : > { %2474 = vtanh.f32 %v2969_v12  ;;  %v2979_v20 = vmul.f32 0.5, %v652_v14  ;;  %v654_v21 = vadd.f32 %v653_v16, %v466_v56  ;;  %v697_v22 = vadd.f32 %v696_v17, %v474_v57 }
 0x1f7   : > { %2476 = vtanh.f32 %v2971_v13  ;;  %v2982_v23 = vmul.f32 0.5, %v695_v15  ;;  %v733_v24 = vpop.f32.mrf.mxu1  ;;  %v776_v25 = vpop.f32.mrf.mxu0 }
 0x1f8   : > { %2478 = vtanh.f32 %v2979_v20  ;;  %v2985_v26 = vmul.f32 0.5, %v654_v21  ;;  %v2987_v27 = vmul.f32 0.5, %v697_v22  ;;  %v734_v28 = vadd.f32 %v733_v24, %v478_v10 }
 0x1f9   : > { %2480 = vtanh.f32 %v2982_v23  ;;  %v777_v30 = vadd.f32 %v776_v25, %v486_v11  ;;  %v735_v31 = vpop.f32.mrf.mxu1  ;;  %v778_v32 = vpop.f32.mrf.mxu0 }
 0x1fa   : > { %2482 = vtanh.f32 %v2985_v26  ;;  %v2994_v33 = vmul.f32 0.5, %v734_v28  ;;  %v736_v34 = vadd.f32 %v735_v31, %v482_v18  ;;  %v779_v35 = vadd.f32 %v778_v32, %v490_v19 }
 0x1fb   : > { %2484 = vtanh.f32 %v2987_v27  ;;  %v2997_v36 = vmul.f32 0.5, %v777_v30  ;;  %v737_v37 = vpop.f32.mrf.mxu1  ;;  %v780_v38 = vpop.f32.mrf.mxu0  ;;  %v2755_v28 = vmov 1966171168  }
 0x1fc   : > { %2486 = vtanh.f32 %v2994_v33  ;;  %v3001_v40 = vmul.f32 0.5, %v736_v34  ;;  %v3003_v41 = vmul.f32 0.5, %v779_v35  ;;  %v738_v42 = vadd.f32 %v737_v37, %v478_v10 }
 0x1fd   : > { %2488 = vtanh.f32 %v2997_v36  ;;  %v781_v43 = vadd.f32 %v780_v38, %v486_v11  ;;  %v739_v44 = vpop.f32.mrf.mxu1  ;;  %v782_v45 = vpop.f32.mrf.mxu0  ;;  %v3026_v29 = vunpack.c.l.s4 %v2755_v28 }
 0x1fe   : > { %2490 = vtanh.f32 %v3001_v40  ;;  %v3008_v51 = vmul.f32 0.5, %v738_v42  ;;  %v740_v54 = vadd.f32 %v739_v44, %v482_v18  ;;  %v783_v55 = vadd.f32 %v782_v45, %v490_v19 }
 0x1ff   : > { %2492 = vtanh.f32 %v3003_v41  ;;  %v3011_v56 = vmul.f32 0.5, %v781_v43  ;;  %v819_v57 = vpop.f32.mrf.mxu1 }
 0x200   : > { %2494 = vtanh.f32 %v3008_v51  ;;  %v3014_v58 = vmul.f32 0.5, %v740_v54  ;;  %v3016_v59 = vmul.f32 0.5, %v783_v55  ;;  %v820_v62 = vadd.f32 %v819_v57, %v494_v39 }
 0x201   : > { %v2471_v63 = vpop.eup %2470  ;;  %2496 = vtanh.f32 %v3011_v56  ;;  %v821_v0 = vpop.f32.mrf.mxu1 }
 0x202   : > { %v2473_v1 = vpop.eup %2472  ;;  %v868_v6 = vadd.f32 1.0, %v2471_v63  ;;  %2498 = vtanh.f32 %v3014_v58  ;;  %v822_v7 = vadd.f32 %v821_v0, %v498_v46  ;;  %v3021_v10 = vmul.f32 0.5, %v820_v62 }
 0x203   : > { %v2475_v8 = vpop.eup %2474  ;;  %v870_v9 = vadd.f32 1.0, %v2473_v1  ;;  %2500 = vtanh.f32 %v3016_v59  ;;  %v823_v11 = vpop.f32.mrf.mxu1 }
 0x204   : > { %v2477_v14 = vpop.eup %2476  ;;  %v869_v15 = vadd.f32 1.0, %v2475_v8  ;;  %v3023_v18 = vmul.f32 0.5, %v822_v7  ;;  %v824_v19 = vadd.f32 %v823_v11, %v494_v39  ;;  %v888_v24 = vmul.f32 %v868_v6, %v2960_v4 }
 0x205   : > { %v2479_v16 = vpop.eup %2478  ;;  %v871_v17 = vadd.f32 1.0, %v2477_v14  ;;  %v825_v21 = vpop.f32.mrf.mxu1  ;;  %v890_v32 = vmul.f32 %v870_v9, %v2962_v5  ;;  %2502 = vtanh.f32 %v3021_v10 }
 0x206   : > { %v2481_v22 = vpop.eup %2480  ;;  %v878_v25 = vadd.f32 1.0, %v2479_v16  ;;  %v826_v30 = vadd.f32 %v825_v21, %v498_v46  ;;  %v3030_v35 = vmul.f32 0.5, %v824_v19  ;;  %v889_v38 = vmul.f32 %v869_v15, %v2969_v12 }
 0x207   : > { %v2483_v31 = vpop.eup %2482  ;;  %v880_v34 = vadd.f32 1.0, %v2481_v22  ;;  %v891_v44 = vmul.f32 %v871_v17, %v2971_v13  ;;  %2504 = vtanh.f32 %v3023_v18 }
 0x208   : > { %v2485_v37 = vpop.eup %2484  ;;  %v898_v39 = vmul.f32 %v878_v25, %v2979_v20  ;;  %v879_v42 = vadd.f32 1.0, %v2483_v31  ;;  %v3034_v4 = vmul.f32 0.5, %v826_v30  ;;  %2506 = vtanh.f32 %v3030_v35 }
 0x209   : > { %v2487_v43 = vpop.eup %2486  ;;  %v900_v45 = vmul.f32 %v880_v34, %v2982_v23  ;;  %v881_v46 = vadd.f32 1.0, %v2485_v37 }
 0x20a   : > { %v2489_v5 = vpop.eup %2488  ;;  %v910_v54 = vadd.f32 %v898_v39, %v888_v24  ;;  %v899_v55 = vmul.f32 %v879_v42, %v2985_v26  ;;  %v872_v57 = vadd.f32 1.0, %v2487_v43  ;;  %2508 = vtanh.f32 %v3034_v4 }
 0x20b   : > { %v2491_v12 = vpop.eup %2490  ;;  %v924_v20 = vadd.f32 %v900_v45, %v890_v32  ;;  %v901_v62 = vmul.f32 %v881_v46, %v2987_v27  ;;  %v874_v63 = vadd.f32 1.0, %v2489_v5 }
 0x20c   : > { %v2493_v13 = vpop.eup %2492  ;;  %v911_v0 = vrot.slane %v910_v54, 4  ;;  %v917_v23 = vadd.f32 %v899_v55, %v889_v38  ;;  %v892_v1 = vmul.f32 %v872_v57, %v2994_v33  ;;  %v873_v6 = vadd.f32 1.0, %v2491_v12 }
 0x20d   : > { %v2495_v7 = vpop.eup %2494  ;;  %v925_v8 = vrot.slane %v924_v20, 4  ;;  %v931_v9 = vadd.f32 %v901_v62, %v891_v44  ;;  %v894_v26 = vmul.f32 %v874_v63, %v2997_v36  ;;  %v875_v11 = vadd.f32 1.0, %v2493_v13 }
 0x20e   : > { %v2497_v14 = vpop.eup %2496  ;;  %v912_v15 = vadd.f32 %v911_v0, %v910_v54  ;;  %v918_v16 = vrot.slane %v917_v23, 4  ;;  %v893_v27 = vmul.f32 %v873_v6, %v3001_v40  ;;  %v882_v17 = vadd.f32 1.0, %v2495_v7 }
 0x20f   : > { %v2499_v19 = vpop.eup %2498  ;;  %v926_v21 = vadd.f32 %v925_v8, %v924_v20  ;;  %v932_v22 = vrot.slane %v931_v9, 4  ;;  %v895_v24 = vmul.f32 %v875_v11, %v3003_v41  ;;  %v884_v25 = vadd.f32 1.0, %v2497_v14 }
 0x210   : > { %v2501_v33 = vpop.eup %2500  ;;  %v913_v28 = vrot.slane %v912_v15, 2  ;;  %v919_v30 = vadd.f32 %v918_v16, %v917_v23  ;;  %v902_v31 = vmul.f32 %v882_v17, %v3008_v51  ;;  %v883_v32 = vadd.f32 1.0, %v2499_v19 }
 0x211   : > { %v927_v36 = vrot.slane %v926_v21, 2  ;;  %v933_v34 = vadd.f32 %v932_v22, %v931_v9  ;;  %v904_v37 = vmul.f32 %v884_v25, %v3011_v56  ;;  %v885_v38 = vadd.f32 1.0, %v2501_v33 }
 0x212   : > { %v914_v39 = vadd.f32 %v913_v28, %v912_v15  ;;  %v920_v40 = vrot.slane %v919_v30, 2  ;;  %v938_v42 = vadd.f32 %v902_v31, %v892_v1  ;;  %v903_v43 = vmul.f32 %v883_v32, %v3014_v58  ;;  %v2503_v5 = vpop.eup %2502 }
 0x213   : > { %v928_v44 = vadd.f32 %v927_v36, %v926_v21  ;;  %v934_v45 = vrot.slane %v933_v34, 2  ;;  %v952_v41 = vadd.f32 %v904_v37, %v894_v26  ;;  %v905_v46 = vmul.f32 %v885_v38, %v3016_v59 }
 0x214   : > { %v921_v54 = vadd.f32 %v920_v40, %v919_v30  ;;  %v939_v55 = vrot.slane %v938_v42, 4  ;;  %v945_v51 = vadd.f32 %v903_v43, %v893_v27  ;;  %v996_v57 = vunpack.c.0.s8 %v3026_v29  ;;  %v2505_v62 = vpop.eup %2504 }
 0x215   : > { %v935_v12 = vadd.f32 %v934_v45, %v933_v34  ;;  %v953_v20 = vrot.slane %v952_v41, 4  ;;  %v959_v56 = vadd.f32 %v905_v46, %v895_v24  ;;  %v915_v63 = vrot.slane %v914_v39, 1  ;;  %v2507_v58 = vpop.eup %2506 }
 0x216   : > { %v922_v13 = vrot.slane %v921_v54, 1  ;;  %v940_v0 = vadd.f32 %v939_v55, %v938_v42  ;;  %v946_v23 = vrot.slane %v945_v51, 4  ;;  %v929_v1 = vrot.slane %v928_v44, 1 }
 0x217   : > { %v936_v6 = vrot.slane %v935_v12, 1  ;;  %v954_v7 = vadd.f32 %v953_v20, %v952_v41  ;;  %v960_v8 = vrot.slane %v959_v56, 4  ;;  %v2509_v59 = vpop.eup %2508  ;;  %v3053_v14 = vsub.s32 %v996_v57, %v2937_v48 }
 0x218   : > { %v923_v9 = vadd.f32 %v922_v13, %v921_v54  ;;  %v941_v26 = vrot.slane %v940_v0, 2  ;;  %v947_v11 = vadd.f32 %v946_v23, %v945_v51  ;;  %v916_v27 = vadd.f32 %v915_v63, %v914_v39 }
 0x219   : > { %v937_v29 = vadd.f32 %v936_v6, %v935_v12  ;;  %v955_v15 = vrot.slane %v954_v7, 2  ;;  %v961_v16 = vadd.f32 %v960_v8, %v959_v56  ;;  %v876_v21 = vadd.f32 1.0, %v2503_v5 }
 0x21a   : > { %v942_v17 = vadd.f32 %v941_v26, %v940_v0  ;;  %v948_v19 = vrot.slane %v947_v11, 2  ;;  %v930_v22 = vadd.f32 %v929_v1, %v928_v44  ;;  %v877_v33 = vadd.f32 1.0, %v2505_v62 }
 0x21b   : > { %v956_v24 = vadd.f32 %v955_v15, %v954_v7  ;;  %v962_v25 = vrot.slane %v961_v16, 2  ;;  %v990_v28 = vcombine.low %v916_v27, %v923_v9  ;;  %v886_v32 = vadd.f32 1.0, %v2507_v58 }
 0x21c   : > { %v943_v30 = vrot.slane %v942_v17, 1  ;;  %v949_v31 = vadd.f32 %v948_v19, %v947_v11  ;;  %v991_v36 = vcombine.low %v930_v22, %v937_v29  ;;  %v887_v38 = vadd.f32 1.0, %v2509_v59  ;;  %v908_v59 = vld [vmem:[#allocation2] sm:$0xff]  ;;  %v909_v19 = vld [vmem:[#allocation2 + $0x8] sm:$0x3] }
 0x21d   : > { %v957_v34 = vrot.slane %v956_v24, 1  ;;  %v963_v37 = vadd.f32 %v962_v25, %v961_v16  ;;  %v896_v42 = vmul.f32 %v876_v21, %v3021_v10  ;;  %v906_v39 = vmul.f32 %v886_v32, %v3030_v35 }
 0x21e   : > { %v950_v40 = vrot.slane %v949_v31, 1  ;;  %v897_v45 = vmul.f32 %v877_v33, %v3023_v18  ;;  %v907_v44 = vmul.f32 %v887_v38, %v3034_v4  ;;  %v1000_v41 = vrot.slane %v990_v28, %v3053_v14 }
 0x21f   : > { %v964_v43 = vrot.slane %v963_v37, 1  ;;  %v944_v46 = vadd.f32 %v943_v30, %v942_v17  ;;  %v966_v54 = vadd.f32 %v906_v39, %v896_v42  ;;  %v1007_v55 = vrot.slane %v991_v36, %v3053_v14 }
 0x220   : > { %v951_v5 = vadd.f32 %v950_v40, %v949_v31  ;;  %v958_v51 = vadd.f32 %v957_v34, %v956_v24  ;;  %v973_v12 = vadd.f32 %v907_v44, %v897_v45 }
 0x221   : > { %v965_v57 = vadd.f32 %v964_v43, %v963_v37  ;;  %v967_v56 = vrot.slane %v966_v54, 4  ;;  %v1022_v18 = vcombine.low %v1000_v41, %v1007_v55 }
 0x222   : > { %v992_v20 = vcombine.low %v944_v46, %v951_v5  ;;  %v974_v62 = vrot.slane %v973_v12, 4 }
 0x223   : > { %v993_v10 = vcombine.low %v958_v51, %v965_v57  ;;  %v968_v63 = vadd.f32 %v967_v56, %v966_v54  ;;  %v1030_v6 = vrot.slane %v1022_v18, %v3053_v14 }
 0x224   : > { %v1014_v35 = vrot.slane %v992_v20, %v3053_v14  ;;  %v975_v13 = vadd.f32 %v974_v62, %v973_v12 }
 0x225   : > { %v1021_v4 = vrot.slane %v993_v10, %v3053_v14  ;;  %v969_v0 = vrot.slane %v968_v63, 2 }
 0x226   : > { %v976_v58 = vrot.slane %v975_v13, 2 }
 0x227   : > { %v1023_v23 = vcombine.low %v1014_v35, %v1021_v4  ;;  %v970_v1 = vadd.f32 %v969_v0, %v968_v63 }
 0x228   : > { %v977_v8 = vadd.f32 %v976_v58, %v975_v13 }
 0x229   : > { %v1037_v7 = vrot.slane %v1023_v23, %v3053_v14  ;;  %v971_v9 = vrot.slane %v970_v1, 1 }
 0x22a   : > { %v978_v11 = vrot.slane %v977_v8, 1 }
 0x22b   : > { %v1038_v26 = vcombine.low %v1030_v6, %v1037_v7  ;;  %v972_v15 = vadd.f32 %v971_v9, %v970_v1 }
 0x22c   : > { %v979_v16 = vadd.f32 %v978_v11, %v977_v8 }
 0x22d   : > { %v1056_v29 = vadd.f32 %v1038_v26, %v908_v59 }
 0x22e   : > { %v1039_v27 = vcombine.low %v972_v15, %v979_v16 }
 0x22f   : > { %1058 = vst [vmem:[#allocation2] sm:$0xff] %v1056_v29 }
 0x230   : > { %v1046_v17 = vrot.slane %v1039_v27, %v3053_v14 }
 0x232   : > { %v1053_v21 = vrot.slane %v1046_v17, %v3053_v14  ;;  %1067 = sbr.rel (%p2126_p1) target bundleno = 864 (0x360), region = 64 }
 0x234   : > { %v1057_v22 = vadd.f32 %v1053_v21, %v909_v19 }
 0x236   : > { %1063 = vst.msk [vmem:[#allocation2 + $0x8] sm:$0x3] %vm1061_vm6, %v1057_v22 }
 0x237   : > { %v2510_v24 = vld [vmem:[#allocation6 + $0x78] sm:$0xff]   ;;  %v2514_v30 = vld [vmem:[#allocation6 + $0x70] sm:$0xff]   ;;  %v2518_v47 = vld [vmem:[#allocation6 + $0x68] sm:$0xff]  }
 0x238   : > { %v2511_v25 = vld [vmem:[#allocation6 + $0x38] sm:$0xff]   ;;  %2213 = vmatprep.subr.bf16.mxu0 %v2510_v24  ;;  %v2515_v31 = vld [vmem:[#allocation6 + $0x30] sm:$0xff]   ;;  %v2519_v36 = vld [vmem:[#allocation6 + $0x28] sm:$0xff]  }
 0x239   : > { %v2512_v33 = vld [vmem:[#allocation6 + $0xf8] sm:$0xff]   ;;  %2214 = vmatpush3.bf16.msra.mxu0 %v2511_v25  ;;  %v2516_v32 = vld [vmem:[#allocation6 + $0xf0] sm:$0xff]   ;;  %v2520_v34 = vld [vmem:[#allocation6 + $0xe8] sm:$0xff]  }
 0x23a   : > { %v2513_v28 = vld [vmem:[#allocation6 + $0xb8] sm:$0xff]   ;;  %2235 = vmatprep.subr.bf16.mxu1 %v2512_v33  ;;  %2215 = vmatprep.subr.bf16.mxu0 %v2514_v30  ;;  %v2517_v14 = vld [vmem:[#allocation6 + $0xb0] sm:$0xff]   ;;  %v2521_v37 = vld [vmem:[#allocation6 + $0xa8] sm:$0xff]  }
 0x23b   : > { %2236 = vmatpush3.bf16.msra.mxu1 %v2513_v28  ;;  %v2522_v38 = vld [vmem:[#allocation6 + $0x60] sm:$0xff]   ;;  %v2526_v43 = vld [vmem:[#allocation6 + $0x58] sm:$0xff]   ;;  %v2530_v46 = vld [vmem:[#allocation6 + $0x50] sm:$0xff]  }
 0x23c   : > { %2237 = vmatprep.subr.bf16.mxu1 %v2516_v32  ;;  %v2523_v40 = vld [vmem:[#allocation6 + $0x20] sm:$0xff]   ;;  %v2527_v45 = vld [vmem:[#allocation6 + $0x18] sm:$0xff]   ;;  %v2531_v5 = vld [vmem:[#allocation6 + $0x10] sm:$0xff]  }
 0x23d   : > { %2216 = vmatpush3.bf16.msra.mxu0 %v2515_v31  ;;  %v2524_v42 = vld [vmem:[#allocation6 + $0xe0] sm:$0xff]   ;;  %v2528_v44 = vld [vmem:[#allocation6 + $0xd8] sm:$0xff]   ;;  %v2532_v54 = vld [vmem:[#allocation6 + $0xd0] sm:$0xff]  }
 0x23e   : > { %2217 = vmatprep.subr.bf16.mxu0 %v2518_v47  ;;  %v2525_v39 = vld [vmem:[#allocation6 + $0xa0] sm:$0xff]   ;;  %v2529_v41 = vld [vmem:[#allocation6 + $0x98] sm:$0xff]   ;;  %v2533_v55 = vld [vmem:[#allocation6 + $0x90] sm:$0xff]  }
 0x23f   : > { %2238 = vmatpush3.bf16.msra.mxu1 %v2517_v14  ;;  %v2534_v51 = vld [vmem:[#allocation6 + $0x48] sm:$0xff]   ;;  %v2538_v56 = vld [vmem:[#allocation6 + $0x40] sm:$0xff]   ;;  %v1068_v35 = vld [vmem:[#allocation2] sm:$0xff] }
 0x240   : > { %2239 = vmatprep.subr.bf16.mxu1 %v2520_v34  ;;  %v2535_v57 = vld [vmem:[#allocation6 + $0x8] sm:$0xff]   ;;  %v2539_v10 = vld [vmem:[#allocation6] sm:$0xff]   ;;  %v3069_v63 = vmul.f32 0.015625, %v1068_v35  ;;  %v2542_v4 = vld [vmem:[#allocation6 + $0x178] sm:$0xff]  }
 0x241   : > { %2218 = vmatpush3.bf16.msra.mxu0 %v2519_v36  ;;  %v2536_v12 = vld [vmem:[#allocation6 + $0xc8] sm:$0xff]   ;;  %v2540_v62 = vld [vmem:[#allocation6 + $0xc0] sm:$0xff]   ;;  %v2543_v58 = vld [vmem:[#allocation6 + $0x138] sm:$0xff]  }
 0x242   : > { %2219 = vmatprep.subr.bf16.mxu0 %v2522_v38  ;;  %v2537_v20 = vld [vmem:[#allocation6 + $0x88] sm:$0xff]   ;;  %v2541_v18 = vld [vmem:[#allocation6 + $0x80] sm:$0xff]   ;;  %v1081_v13 = vrot.slane %v3069_v63, %v2947_v52  ;;  %v1077_v0 = vrot.slane %v3069_v63, %v2940_v49  ;;  %v1089_v23 = vrot.slane %v3069_v63, %v473_v53  ;;  %v1085_v1 = vrot.slane %v3069_v63, %v469_v50  ;;  %v2544_v6 = vld [vmem:[#allocation6 + $0x1f8] sm:$0xff]  }
 0x243   : > { %2240 = vmatpush3.bf16.msra.mxu1 %v2521_v37  ;;  %v1097_v7 = vrot.slane %v3069_v63, %v481_v2  ;;  %v1105_v8 = vrot.slane %v3069_v63, %v489_v3  ;;  %v2545_v53 = vld [vmem:[#allocation6 + $0x1b8] sm:$0xff]   ;;  %v2546_v29 = vld [vmem:[#allocation6 + $0x170] sm:$0xff]   ;;  %v2550_v3 = vld [vmem:[#allocation6 + $0x168] sm:$0xff]  }
 0x244   : > { %2241 = vmatprep.subr.bf16.mxu1 %v2524_v42  ;;  %v1125_v59 = vpack.c.bf16 %v1081_v13, %v1081_v13  ;;  %v1124_v9 = vpack.c.bf16 %v1077_v0, %v1077_v0  ;;  %v1127_v26 = vpack.c.bf16 %v1089_v23, %v1089_v23  ;;  %v1126_v11 = vpack.c.bf16 %v1085_v1, %v1085_v1  ;;  %v2547_v50 = vld [vmem:[#allocation6 + $0x130] sm:$0xff]   ;;  %v2551_v17 = vld [vmem:[#allocation6 + $0x128] sm:$0xff]   ;;  %v2554_v22 = vld [vmem:[#allocation6 + $0x160] sm:$0xff]  }
 0x245   : > { %2220 = vmatpush3.bf16.msra.mxu0 %v2523_v40  ;;  %v1129_v15 = vpack.c.bf16 %v1097_v7, %v1097_v7  ;;  %v1131_v16 = vpack.c.bf16 %v1105_v8, %v1105_v8  ;;  %v2548_v27 = vld [vmem:[#allocation6 + $0x1f0] sm:$0xff]   ;;  %v2552_v19 = vld [vmem:[#allocation6 + $0x1e8] sm:$0xff]   ;;  %v2555_v24 = vld [vmem:[#allocation6 + $0x120] sm:$0xff]  }
 0x246   : > { %2221 = vmatprep.subr.bf16.mxu0 %v2526_v43  ;;  %1807 = vmatprep.mubr.bf16.mxu0 %v1125_v59  ;;  %v2549_v2 = vld [vmem:[#allocation6 + $0x1b0] sm:$0xff]   ;;  %v2553_v21 = vld [vmem:[#allocation6 + $0x1a8] sm:$0xff]   ;;  %v2556_v25 = vld [vmem:[#allocation6 + $0x1e0] sm:$0xff]  }
 0x247   : > { %2242 = vmatpush3.bf16.msra.mxu1 %v2525_v39  ;;  %1847 = vmatprep.mubr.bf16.mxu1 %v1127_v26  ;;  %v2557_v33 = vld [vmem:[#allocation6 + $0x1a0] sm:$0xff]   ;;  %v2558_v28 = vld [vmem:[#allocation6 + $0x158] sm:$0xff]   ;;  %v2562_v14 = vld [vmem:[#allocation6 + $0x150] sm:$0xff]  }
 0x248   : > { %2243 = vmatprep.subr.bf16.mxu1 %v2528_v44  ;;  %v2559_v30 = vld [vmem:[#allocation6 + $0x118] sm:$0xff]   ;;  %v2563_v47 = vld [vmem:[#allocation6 + $0x110] sm:$0xff]   ;;  %v2566_v37 = vld [vmem:[#allocation6 + $0x148] sm:$0xff]   ;;  %v1093_v44 = vrot.slane %v3069_v63, %v477_v60 }
 0x249   : > { %2222 = vmatpush3.bf16.msra.mxu0 %v2527_v45  ;;  %v2560_v31 = vld [vmem:[#allocation6 + $0x1d8] sm:$0xff]   ;;  %v2564_v36 = vld [vmem:[#allocation6 + $0x1d0] sm:$0xff]   ;;  %v2567_v38 = vld [vmem:[#allocation6 + $0x108] sm:$0xff]  }
 0x24a   : > { %2223 = vmatprep.subr.bf16.mxu0 %v2530_v46  ;;  %v2561_v32 = vld [vmem:[#allocation6 + $0x198] sm:$0xff]   ;;  %v2565_v34 = vld [vmem:[#allocation6 + $0x190] sm:$0xff]   ;;  %v2568_v40 = vld [vmem:[#allocation6 + $0x1c8] sm:$0xff]  }
 0x24b   : > { %2244 = vmatpush3.bf16.msra.mxu1 %v2529_v41  ;;  %v2569_v42 = vld [vmem:[#allocation6 + $0x188] sm:$0xff]   ;;  %v2570_v39 = vld [vmem:[#allocation6 + $0x140] sm:$0xff]   ;;  %v1101_v41 = vrot.slane %v3069_v63, %v485_v61  ;;  %v2577_v60 = vld [vmem:[#allocation6 + $0x230] sm:$0xff]  }
 0x24c   : > { %2245 = vmatprep.subr.bf16.mxu1 %v2532_v54  ;;  %v2571_v43 = vld [vmem:[#allocation6 + $0x100] sm:$0xff]   ;;  %v1128_v54 = vpack.c.bf16 %v1093_v44, %v1093_v44  ;;  %v2578_v48 = vld [vmem:[#allocation6 + $0x268] sm:$0xff]   ;;  %v2583_v63 = vld [vmem:[#allocation6 + $0x218] sm:$0xff]  }
 0x24d   : > { %2224 = vmatpush3.bf16.msra.mxu0 %v2531_v5  ;;  %v2572_v45 = vld [vmem:[#allocation6 + $0x1c0] sm:$0xff]   ;;  %v2574_v5 = vld [vmem:[#allocation6 + $0x278] sm:$0xff]   ;;  %v2579_v61 = vld [vmem:[#allocation6 + $0x228] sm:$0xff]  }
 0x24e   : > { %2225 = vmatprep.subr.bf16.mxu0 %v2534_v51  ;;  %v2573_v46 = vld [vmem:[#allocation6 + $0x180] sm:$0xff]   ;;  %v2575_v51 = vld [vmem:[#allocation6 + $0x238] sm:$0xff]   ;;  %v2585_v13 = vld [vmem:[#allocation6 + $0x210] sm:$0xff]  }
 0x24f   : > { %2246 = vmatpush3.bf16.msra.mxu1 %v2533_v55  ;;  %v1130_v55 = vpack.c.bf16 %v1101_v41, %v1101_v41  ;;  %v2586_v0 = vld [vmem:[#allocation6 + $0x248] sm:$0xff]  }
 0x250   : > { %2247 = vmatprep.subr.bf16.mxu1 %v2536_v12  ;;  %v2580_v12 = vld [vmem:[#allocation6 + $0x260] sm:$0xff]   ;;  %v2587_v23 = vld [vmem:[#allocation6 + $0x208] sm:$0xff]  }
 0x251   : > { %2226 = vmatpush3.bf16.msra.mxu0 %v2535_v57  ;;  %v2576_v57 = vld [vmem:[#allocation6 + $0x270] sm:$0xff]  }
 0x252   : > { %2227 = vmatprep.subr.bf16.mxu0 %v2538_v56  ;;  %v1069_v56 = vld [vmem:[#allocation2 + $0x8] sm:$0x3] }
 0x253   : > { %2248 = vmatpush3.bf16.msra.mxu1 %v2537_v20  ;;  %v2581_v20 = vld [vmem:[#allocation6 + $0x220] sm:$0xff]  }
 0x254   : > { %2249 = vmatprep.subr.bf16.mxu1 %v2540_v62  ;;  %v1071_v62 = vmul.f32 0.015625, %v1069_v56 }
 0x255   : > { %2228 = vmatpush3.bf16.msra.mxu0 %v2539_v10  ;;  %v2582_v10 = vld [vmem:[#allocation6 + $0x258] sm:$0xff]  }
 0x256   : > { %2257 = vmatprep.subr.bf16.mxu0 %v2542_v4  ;;  %v1113_v35 = vrot.slane %v1071_v62, %v2947_v52  ;;  %v1109_v1 = vrot.slane %v1071_v62, %v2940_v49 }
 0x257   : > { %2250 = vmatpush3.bf16.msra.mxu1 %v2541_v18  ;;  %v2584_v18 = vld [vmem:[#allocation6 + $0x250] sm:$0xff]  }
 0x258   : > { %2279 = vmatprep.subr.bf16.mxu1 %v2544_v6  ;;  %1808 = vmatmul.mubr.bf16.vlgmr.msra.gmra.mxu0 %v1124_v9  ;;  %v1133_v4 = vpack.c.bf16 %v1113_v35, %v1113_v35  ;;  %v2589_v6 = vld [vmem:[#allocation6 + $0x200] sm:$0xff]   ;;  %v1132_v52 = vpack.c.bf16 %v1109_v1, %v1109_v1 }
 0x259   : > { %2258 = vmatpush3.bf16.msra.mxu0 %v2543_v58  ;;  %1887 = vmatprep.mubr.bf16.mxu0 %v1129_v15  ;;  %v2588_v58 = vld [vmem:[#allocation6 + $0x240] sm:$0xff]  }
 0x25a   : > { %1848 = vmatmul.mubr.bf16.vlgmr.msra.gmra.mxu1 %v1126_v11  ;;  %2259 = vmatprep.subr.bf16.mxu0 %v2546_v29 }
 0x25b   : > { %2280 = vmatpush3.bf16.msra.mxu1 %v2545_v53  ;;  %1927 = vmatprep.mubr.bf16.mxu1 %v1131_v16 }
 0x25c   : > { %2281 = vmatprep.subr.bf16.mxu1 %v2548_v27 }
 0x25d   : > { %2260 = vmatpush3.bf16.msra.mxu0 %v2547_v50 }
 0x25e   : > { %2261 = vmatprep.subr.bf16.mxu0 %v2550_v3 }
 0x25f   : > { %2282 = vmatpush3.bf16.msra.mxu1 %v2549_v2 }
 0x260   : > { %2283 = vmatprep.subr.bf16.mxu1 %v2552_v19 }
 0x261   : > { %2262 = vmatpush3.bf16.msra.mxu0 %v2551_v17 }
 0x262   : > { %2263 = vmatprep.subr.bf16.mxu0 %v2554_v22 }
 0x263   : > { %2284 = vmatpush3.bf16.msra.mxu1 %v2553_v21  ;;  %v1294_v21 = vld [vmem:[%s3152_s6] sm:$0x1] }
 0x264   : > { %2285 = vmatprep.subr.bf16.mxu1 %v2556_v25 }
 0x265   : > { %2264 = vmatpush3.bf16.msra.mxu0 %v2555_v24 }
 0x266   : > { %2265 = vmatprep.subr.bf16.mxu0 %v2558_v28 }
 0x267   : > { %2286 = vmatpush3.bf16.msra.mxu1 %v2557_v33 }
 0x268   : > { %2287 = vmatprep.subr.bf16.mxu1 %v2560_v31 }
 0x269   : > { %2266 = vmatpush3.bf16.msra.mxu0 %v2559_v30 }
 0x26a   : > { %2267 = vmatprep.subr.bf16.mxu0 %v2562_v14 }
 0x26b   : > { %2288 = vmatpush3.bf16.msra.mxu1 %v2561_v32 }
 0x26c   : > { %2289 = vmatprep.subr.bf16.mxu1 %v2564_v36 }
 0x26d   : > { %2268 = vmatpush3.bf16.msra.mxu0 %v2563_v47 }
 0x26e   : > { %2269 = vmatprep.subr.bf16.mxu0 %v2566_v37 }
 0x26f   : > { %2290 = vmatpush3.bf16.msra.mxu1 %v2565_v34 }
 0x270   : > { %2291 = vmatprep.subr.bf16.mxu1 %v2568_v40 }
 0x271   : > { %2270 = vmatpush3.bf16.msra.mxu0 %v2567_v38 }
 0x272   : > { %2271 = vmatprep.subr.bf16.mxu0 %v2570_v39 }
 0x273   : > { %2292 = vmatpush3.bf16.msra.mxu1 %v2569_v42 }
 0x274   : > { %2293 = vmatprep.subr.bf16.mxu1 %v2572_v45 }
 0x275   : > { %2272 = vmatpush3.bf16.msra.mxu0 %v2571_v43 }
 0x276   : > { %2301 = vmatprep.subr.bf16.mxu0 %v2574_v5 }
 0x277   : > { %2294 = vmatpush3.bf16.msra.mxu1 %v2573_v46 }
 0x278   : > { %1888 = vmatmul.mubr.bf16.vlgmr.msra.gmra.mxu0 %v1128_v54 }
 0x279   : > { %2302 = vmatpush3.bf16.msra.mxu0 %v2575_v51  ;;  %1967 = vmatprep.mubr.bf16.mxu0 %v1133_v4 }
 0x27a   : > { %1928 = vmatmul.mubr.bf16.vlgmr.msra.gmra.mxu1 %v1130_v55  ;;  %2303 = vmatprep.subr.bf16.mxu0 %v2576_v57 }
 0x27d   : > { %2304 = vmatpush3.bf16.msra.mxu0 %v2577_v60 }
 0x27e   : > { %2305 = vmatprep.subr.bf16.mxu0 %v2578_v48 }
 0x281   : > { %2306 = vmatpush3.bf16.msra.mxu0 %v2579_v61 }
 0x282   : > { %2307 = vmatprep.subr.bf16.mxu0 %v2580_v12 }
 0x285   : > { %2308 = vmatpush3.bf16.msra.mxu0 %v2581_v20 }
 0x286   : > { %2309 = vmatprep.subr.bf16.mxu0 %v2582_v10 }
 0x289   : > { %2310 = vmatpush3.bf16.msra.mxu0 %v2583_v63 }
 0x28a   : > { %2311 = vmatprep.subr.bf16.mxu0 %v2584_v18 }
 0x28d   : > { %2312 = vmatpush3.bf16.msra.mxu0 %v2585_v13 }
 0x28e   : > { %2313 = vmatprep.subr.bf16.mxu0 %v2586_v0 }
 0x291   : > { %2314 = vmatpush3.bf16.msra.mxu0 %v2587_v23 }
 0x292   : > { %2315 = vmatprep.subr.bf16.mxu0 %v2588_v58 }
 0x295   : > { %2316 = vmatpush3.bf16.msra.mxu0 %v2589_v6 }
 0x298   : > { %1968 = vmatmul.mubr.bf16.vlgmr.msra.gmra.mxu0 %v1132_v52 }
 0x318   : > { %v2229_v7 = vpop.f32.mrf.mxu0 }
 0x31a   : > { %v2251_v8 = vpop.f32.mrf.mxu1  ;;  %v2230_v59 = vpop.f32.mrf.mxu0 }
 0x31b   : > { %v2231_v19 = vadd.f32 %v2230_v59, %v2229_v7 }
 0x31c   : > { %v2252_v9 = vpop.f32.mrf.mxu1  ;;  %v2232_v26 = vpop.f32.mrf.mxu0 }
 0x31d   : > { %v1810_v22 = vadd.f32 %v2231_v19, %v1294_v21  ;;  %v2253_v24 = vadd.f32 %v2252_v9, %v2251_v8 }
 0x31e   : > { %v2254_v11 = vpop.f32.mrf.mxu1  ;;  %v2233_v53 = vpop.f32.mrf.mxu0 }
 0x31f   : > { %v1850_v33 = vadd.f32 %v2253_v24, %v1810_v22 }
 0x320   : > { %v2255_v29 = vpop.f32.mrf.mxu1 }
 0x338   : > { %v2273_v50 = vpop.f32.mrf.mxu0 }
 0x33a   : > { %v2295_v15 = vpop.f32.mrf.mxu1  ;;  %v2274_v16 = vpop.f32.mrf.mxu0 }
 0x33b   : > { %v2275_v25 = vadd.f32 %v2274_v16, %v2273_v50 }
 0x33c   : > { %v2296_v27 = vpop.f32.mrf.mxu1  ;;  %v2276_v2 = vpop.f32.mrf.mxu0 }
 0x33d   : > { %v1890_v28 = vadd.f32 %v2275_v25, %v1850_v33  ;;  %v2297_v30 = vadd.f32 %v2296_v27, %v2295_v15 }
 0x33e   : > { %v2298_v49 = vpop.f32.mrf.mxu1  ;;  %v2277_v3 = vpop.f32.mrf.mxu0 }
 0x33f   : > { %v1930_v14 = vadd.f32 %v2297_v30, %v1890_v28 }
 0x340   : > { %v2299_v17 = vpop.f32.mrf.mxu1 }
 0x358   : > { %v2317_v31 = vpop.f32.mrf.mxu0 }
 0x35a   : > { %v2318_v32 = vpop.f32.mrf.mxu0 }
 0x35b   : > { %v2319_v47 = vadd.f32 %v2318_v32, %v2317_v31 }
 0x35c   : > { %v2320_v36 = vpop.f32.mrf.mxu0 }
 0x35d   : > { %v1970_v34 = vadd.f32 %v2319_v47, %v1930_v14 }
 0x35e   : > { %v2321_v37 = vpop.f32.mrf.mxu0 }
 0x35f   : > { %1975 = vst [vmem:[%s2919_s18] sm:$0x1] %v1970_v34 }
 0x360 PF: > { %s2207_s23 = sshll.u32 %s2730_s28, 4  ;;  %s1989_s12 = sshll.u32 %s2919_s18, 4  ;;  %s1990_s12 = int_to_ptr.vmem [resolvable:$true] %s1989_s12 }
 0x361   : > { %s1987_s11 = scalar_lea.hbm %s3153_s7, %s2207_s23  ;;  %s1977_s16 = scalar_lea.sflag [#allocation5], %s322_s30 }
 0x362   : > { %s2642_s22 = scalar_lea.vmem %s1990_s12, 16  ;;  %s2756_s9 = smov [#allocation8]  }
 0x363   : > { %p2643_p11 = scmp.ne.s32.totalorder %s1990_s12, %s2642_s22  ;;  %s2646_s10 = sshll.u32 %s2756_s9, 4  ;;  %s2647_s10 = int_to_ptr.vmem [resolvable:$false] %s2646_s10 }
 0x364   : > { %s2648_s17 = scalar_lea.vmem %s2647_s10, 32  ;;  %p2649_p4 = scmp.lt.s32.totalorder %s1990_s12, %s2647_s10 }
 0x365   : > { %p2644_p12 = pnand %p2643_p11, %p2847_p3  ;;  %p2650_p5 = scmp.lt.s32.totalorder %s2648_s17, %s2642_s22 }
 0x367   : > { %p2645_p2 = pneg %p2644_p12  ;;  %p2651_p6 = por %p2650_p5, %p2649_p4 }
 0x369   : > { %p2652_p7 = pnand %p2651_p6, %p2645_p2 }
 0x36b   : > { %2655 = shalt.err (!%p2652_p7)
}
 0x36c   : > { %s2656_s28 = scalar_lea.hbm %s1987_s11, 16  ;;  %s2660_s27 = scalar_lea.hbm %s3153_s7, 32 }
 0x36d   : > { %p2657_p8 = scmp.ne.s32.totalorder %s1987_s11, %s2656_s28  ;;  %p2661_p13 = scmp.lt.s32.totalorder %s1987_s11, %s3153_s7 }
 0x36e   : > { %p2662_p1 = scmp.lt.s32.totalorder %s2660_s27, %s2656_s28 }
 0x36f   : > { %p2658_p10 = pnand %p2657_p8, %p2847_p3 }
 0x370   : > { %p2663_p11 = por %p2662_p1, %p2661_p13 }
 0x371   : > { %p2659_p0 = pneg %p2658_p10 }
 0x373   : > { %p2664_p12 = pnand %p2663_p11, %p2659_p0 }
 0x375   : > { %2667 = shalt.err (!%p2664_p12)
}
 0x376   : > { %2339 = dma.vmem_to_hbm [thread:$0]  (%p2847_p3), %s1990_s12, 16, %s1987_s11, %s1977_s16  }
 0x377 PF: > { %p2356_p2 = scmp.ge.s32.totalorder %s2742_s8, 2  ;;  %s2001_s13 = sand.u32 1, %s2714_s24  }
 0x378   : > { %s2002_s21 = scalar_lea.sflag [#allocation5], %s2001_s13 }
 0x379   : > { %p2349_p4 = pnand %p2356_p2, %p2857_p9 }
 0x37b   : > { %p2350_p5 = pneg %p2349_p4 }
 0x37d   : > { %2709 = dma.done.wait (%p2350_p5), %s2002_s21, 16  }
 0x37e   : > { %2711 = vsyncadd (%p2350_p5), %s2002_s21, 4294967280  ;;  %s22_s8 = sadd.s32 1, %s2742_s8   ;;  %s3164_s28 = sld [smem:[#allocation12_spill]] }
 0x37f   : > { %p19_p6 = scmp.ge.s32.totalorder %s22_s8, 10   ;;  %s3165_s14 = sld [smem:[#allocation13_spill]] }
 0x380   : > { %s3166_s30 = sld [smem:[#allocation14_spill]]  ;;  %s3167_s24 = smov %s2718_s25 }
 0x381   : > { %s3168_s25 = smov %s2722_s26  ;;  %s3169_s26 = smov %s2874_s19 }
 0x382   : > { %s3170_s27 = smov %s2734_s29  ;;  %21 = sbr.rel (!%p19_p6) target bundleno = 7 (0x7), region = 100 }
 0x385   : > { %s3171_s29 = smov %s3165_s14 }
 0x387   :  { %2006 = vsyncpa [#allocation4], 1 }
 0x388   :  { %2008 = vsyncpa [#allocation4 + $0x1], 1 }
 0x389   :  { %2009 = vsyncpa [#allocation7], 1 }
 0x38a   :  { %2010 = vsyncpa [#allocation5], 1 }
 0x38b   :  { %2012 = vsyncpa [#allocation5 + $0x1], 1 }

</bundles_post_ra>
